<compile_context>
chip_gen: v7x
topology: tpu7x:2x2x1
jax: 0.10.0
libtpu: 0.0.40
codegen_flags: <defaults>
</compile_context>

<pallas_src>
import functools

import jax
import jax.numpy as jnp
from jax.experimental import pallas as pl
from jax.experimental.pallas import tpu as pltpu

_LANE = 128


def _round_up(a: int, b: int) -> int:
    return -(-a // b) * b


def _sublane(dtype) -> int:
    # 8 rows per sublane group for 32-bit, 16 for bf16, 32 for int8/fp8.
    return max(8, 32 // jnp.dtype(dtype).itemsize)


def _vmem_caps():
    """Return (tile_budget_bytes, vmem_limit_bytes), generation aware."""
    phys = 64 * 1024 * 1024  # most constrained per-core VMEM (v7x); v5e/v6e: 128 MiB
    try:
        info = pltpu.get_tpu_info()
        for attr in ("vmem_capacity_bytes", "vmem_bytes", "vmem_size_bytes"):
            val = getattr(info, attr, None)
            if val:
                phys = int(val)
                break
    except Exception:
        pass
    tile_budget = min(phys // 3, 32 * 1024 * 1024)
    vmem_limit = max(
        16 * 1024 * 1024,
        min(phys - 8 * 1024 * 1024, 2 * tile_budget + 4 * 1024 * 1024),
    )
    return tile_budget, vmem_limit


def _choose_blocks(n: int, f: int, dtype, tile_budget: int):
    """Pick (row_block, f_block) from the VMEM budget."""
    itemsize = jnp.dtype(dtype).itemsize
    sub = _sublane(dtype)
    # Feature chunk: lane-aligned; single chunk for small F, capped for wide F.
    fb = min(_round_up(f + 2, _LANE), 2048)
    # Per-row VMEM: in + out chunks (double-buffered) + f32 temporaries/scratch.
    bytes_per_row = 2 * (2 * fb * itemsize) + 3 * fb * 4 + 64
    rb = max(sub, (tile_budget // max(bytes_per_row, 1)) // sub * sub)
    rb = min(rb, 4096)
    n_ceil = _round_up(n, sub)
    # Prefer >= 4 row-grid steps when N allows: v7x shards the "parallel" axis
    # across 2 TensorCores; 4+ steps keep each TC software-pipelined.
    if n_ceil >= 4 * sub:
        rb = min(rb, _round_up(-(-n // 4), sub))
    rb = min(rb, n_ceil)
    return max(rb, sub), fb


def _var_mean_from_acc(sum_ref, sumsq_ref, f: int):
    """Unbiased var + mean (f32, shape (TM,1)) from single-pass accumulators."""
    s = sum_ref[...]
    mean = s * jnp.float32(1.0 / f)
    inv_dof = jnp.float32(1.0 / (f - 1)) if f > 1 else jnp.float32(float("nan"))
    var = (sumsq_ref[...] - s * mean) * inv_dof
    return var, mean


def _pack2(var, mean):
    """Merge (TM,1) var / mean into a single (TM,2) array (one merged store)."""
    lane = jax.lax.broadcasted_iota(jnp.int32, (var.shape[0], 2), 1)
    return jnp.where(lane == 0, var, mean)


def _accumulate(x, j, f, sum_ref, sumsq_ref):
    """Masked single-pass accumulation of sum / sum-of-squares for one chunk."""
    tm, fb = x.shape
    col = jax.lax.broadcasted_iota(jnp.int32, (tm, fb), 1)
    valid = (j * fb + col) < f          # masks boundary garbage + tail chunks
    xm = jnp.where(valid, x.astype(jnp.float32), 0.0)
    sum_ref[...] += jnp.sum(xm, axis=1, keepdims=True)
    sumsq_ref[...] += jnp.sum(xm * xm, axis=1, keepdims=True)


def _mnbstd_kernel(x_ref, o_ref, sum_ref, sumsq_ref, *, f):
    # x_ref : (TM, FB) input chunk (index clamped on tail steps)
    # o_ref : (TM, FB) output chunk at columns [j*FB, j*FB+FB) of (N, F+2)
    j = pl.program_id(1)
    tm, fb = x_ref.shape
    var_chunk, var_local = divmod(f, fb)        # static: output column F
    mean_chunk, mean_local = divmod(f + 1, fb)  # static: output column F+1

    @pl.when(j == 0)
    def _():
        sum_ref[...] = jnp.zeros_like(sum_ref)
        sumsq_ref[...] = jnp.zeros_like(sumsq_ref)

    x = x_ref[...]
    # Passthrough copy in the original dtype.  Chunk columns falling in
    # [F, F+2) get transient garbage here but are overwritten by the stats
    # store below (same or later grid step); columns >= F+2 are masked by
    # Pallas on writeback.
    o_ref[...] = x

    _accumulate(x, j, f, sum_ref, sumsq_ref)

    if var_chunk == mean_chunk:
        # Common case: var & mean live in the same output chunk -> one (TM,2) store.
        @pl.when(j == var_chunk)
        def _():
            var, mean = _var_mean_from_acc(sum_ref, sumsq_ref, f)
            o_ref[:, var_local:var_local + 2] = _pack2(var, mean).astype(o_ref.dtype)
    else:
        # F % FB == FB-1: stats straddle a chunk boundary -> two single stores.
        @pl.when(j == var_chunk)
        def _():
            var, _ = _var_mean_from_acc(sum_ref, sumsq_ref, f)
            o_ref[:, var_local:var_local + 1] = var.astype(o_ref.dtype)

        @pl.when(j == mean_chunk)
        def _():
            _, mean = _var_mean_from_acc(sum_ref, sumsq_ref, f)
            o_ref[:, mean_local:mean_local + 1] = mean.astype(o_ref.dtype)


def _stats_kernel(x_ref, o_ref, sum_ref, sumsq_ref, *, f):
    # Stats-only kernel for the split-output variant: o_ref is (TM, 2).
    j = pl.program_id(1)

    @pl.when(j == 0)
    def _():
        sum_ref[...] = jnp.zeros_like(sum_ref)
        sumsq_ref[...] = jnp.zeros_like(sumsq_ref)

    _accumulate(x_ref[...], j, f, sum_ref, sumsq_ref)

    @pl.when(j == pl.num_programs(1) - 1)
    def _():
        var, mean = _var_mean_from_acc(sum_ref, sumsq_ref, f)
        o_ref[...] = _pack2(var, mean).astype(o_ref.dtype)


def _resolve_blocks(n, f, dtype, row_block, f_block, tile_budget):
    sub = _sublane(dtype)
    auto_rb, auto_fb = _choose_blocks(n, f, dtype, tile_budget)
    rb = auto_rb if row_block is None else max(sub, _round_up(int(row_block), sub))
    rb = min(rb, _round_up(n, sub))
    fb = auto_fb if f_block is None else max(_LANE, _round_up(int(f_block), _LANE))
    return rb, fb


def mnbstd(x: jax.Array, *, row_block: int | None = None,
           f_block: int | None = None) -> jax.Array:
    """Pallas MNBSTD.forward: (N, F) -> (N, F+2) = [x | var | mean]."""
    n, f = x.shape
    tile_budget, vmem_limit = _vmem_caps()
    rb, fb = _resolve_blocks(n, f, x.dtype, row_block, f_block, tile_budget)

    n_in = -(-f // fb)        # input chunks
    n_j = -(-(f + 2) // fb)   # output chunks (may be n_in or n_in + 1)
    grid = (pl.cdiv(n, rb), n_j)

    return pl.pallas_call(
        functools.partial(_mnbstd_kernel, f=f),
        out_shape=jax.ShapeDtypeStruct((n, f + 2), x.dtype),
        grid_spec=pltpu.PrefetchScalarGridSpec(
            num_scalar_prefetch=0,
            grid=grid,
            in_specs=[pl.BlockSpec(
                (rb, fb), lambda i, j: (i, jnp.minimum(j, n_in - 1)))],
            out_specs=pl.BlockSpec((rb, fb), lambda i, j: (i, j)),
            scratch_shapes=[pltpu.VMEM((rb, 1), jnp.float32),
                            pltpu.VMEM((rb, 1), jnp.float32)],
        ),
        compiler_params=pltpu.CompilerParams(
            dimension_semantics=("parallel", "arbitrary"),
            vmem_limit_bytes=vmem_limit,
        ),
    )(x)


def mnbstd_split(x: jax.Array, *, row_block: int | None = None,
                 f_block: int | None = None):
    """Opt-in variant: returns (x, stats) with stats[:,0]=var, stats[:,1]=mean.

    Skips the N*F passthrough write of the concatenated layout (~2x less HBM
    traffic) for callers that don't need the physical concat.
    """
    n, f = x.shape
    tile_budget, vmem_limit = _vmem_caps()
    rb, fb = _resolve_blocks(n, f, x.dtype, row_block, f_block, tile_budget)

    n_in = -(-f // fb)
    grid = (pl.cdiv(n, rb), n_in)

    stats = pl.pallas_call(
        functools.partial(_stats_kernel, f=f),
        out_shape=jax.ShapeDtypeStruct((n, 2), x.dtype),
        grid_spec=pltpu.PrefetchScalarGridSpec(
            num_scalar_prefetch=0,
            grid=grid,
            in_specs=[pl.BlockSpec((rb, fb), lambda i, j: (i, j))],
            out_specs=pl.BlockSpec((rb, 2), lambda i, j: (i, 0)),
            scratch_shapes=[pltpu.VMEM((rb, 1), jnp.float32),
                            pltpu.VMEM((rb, 1), jnp.float32)],
        ),
        compiler_params=pltpu.CompilerParams(
            dimension_semantics=("parallel", "arbitrary"),
            vmem_limit_bytes=vmem_limit,
        ),
    )(x)
    return x, stats


def _reference(x: jnp.ndarray) -> jnp.ndarray:
    xf = x.astype(jnp.float32)
    mean = jnp.mean(xf, axis=1, keepdims=True)
    var = jnp.sum((xf - mean) ** 2, axis=1, keepdims=True) / (x.shape[1] - 1)
    return jnp.concatenate([x, var.astype(x.dtype), mean.astype(x.dtype)], axis=1)


if __name__ == "__main__":
    key = jax.random.PRNGKey(0)
    k1, k2, k3, k4, k5, k6 = jax.random.split(key, 6)

    def check(out, x, atol=1e-4, rtol=1e-4):
        ref = _reference(x)
        assert out.shape == ref.shape, (out.shape, ref.shape)
        a = out.astype(jnp.float32)
        b = ref.astype(jnp.float32)
        assert jnp.allclose(a, b, atol=atol, rtol=rtol), float(jnp.max(jnp.abs(a - b)))

    # 1) Small module-sized case: batch=8, features=32 (single F chunk).
    x1 = jax.random.normal(k1, (8, 32), dtype=jnp.float32)
    check(jax.block_until_ready(mnbstd(x1)), x1)

    # 2) Row tail (N not a multiple of the row tile) + odd feature width.
    x2 = jax.random.normal(k2, (20, 40), dtype=jnp.float32)
    check(jax.block_until_ready(mnbstd(x2)), x2)

    # 3) Multi-F-chunk path; stats land in the last partial input chunk.
    x3 = jax.random.normal(k3, (16, 300), dtype=jnp.float32)
    check(jax.block_until_ready(mnbstd(x3, row_block=8, f_block=128)), x3)

    # 4) F an exact multiple of f_block -> extra stats-only tail chunk.
    x4 = jax.random.normal(k4, (16, 256), dtype=jnp.float32)
    check(jax.block_until_ready(mnbstd(x4, row_block=8, f_block=128)), x4)

    # 5) F % f_block == f_block - 1 -> var/mean straddle two output chunks.
    x5 = jax.random.normal(k5, (16, 255), dtype=jnp.float32)
    check(jax.block_until_ready(mnbstd(x5, row_block=8, f_block=128)), x5)

    # 6) bf16: passthrough must be bit-exact; stats at bf16 tolerance.
    x6 = jax.random.normal(k6, (16, 64), dtype=jnp.bfloat16)
    o6 = jax.block_until_ready(mnbstd(x6))
    assert o6.shape == (16, 66), o6.shape
    assert jnp.array_equal(o6[:, :64], x6)
    check(o6, x6, atol=5e-2, rtol=5e-2)

    # 7) Split-output variant (skips the N*F passthrough write).
    xs, stats = mnbstd_split(x1)
    stats = jax.block_until_ready(stats)
    ref1 = _reference(x1)
    assert xs is x1
    assert jnp.allclose(stats, ref1[:, 32:], atol=1e-4, rtol=1e-4)

    print("KERNEL_OK")
</pallas_src>

<mosaic_0001>
module attributes {stable_mosaic.version = 11 : i64} {
  func.func @_mnbstd_kernel(%arg0: i32, %arg1: i32, %arg2: memref<8x128xf32, #tpu.memory_space<vmem>>, %arg3: memref<8x128xf32, #tpu.memory_space<vmem>>, %arg4: memref<8x1xf32, #tpu.memory_space<vmem>>, %arg5: memref<8x1xf32, #tpu.memory_space<vmem>>) attributes {dimension_semantics = [#tpu.dimension_semantics<parallel>, #tpu.dimension_semantics<arbitrary>], iteration_bounds = array<i64: 1, 1>, scalar_prefetch = 0 : i64, scratch_operands = 2 : i64, tpu.core_type = #tpu.core_type<tc>, window_params = [{transform_indices = @transform_0, window_bounds = array<i64: 8, 128>}, {transform_indices = @transform_1, window_bounds = array<i64: 8, 128>}]} {
    %c0_i32 = arith.constant 0 : i32
    %0 = arith.cmpi eq, %arg1, %c0_i32 : i32
    %1 = arith.extui %0 : i1 to i32
    %c0_i32_0 = arith.constant 0 : i32
    %2 = arith.cmpi ne, %1, %c0_i32_0 : i32
    scf.if %2 {
      %cst_16 = arith.constant 0.000000e+00 : f32
      %27 = vector.broadcast %cst_16 : f32 to vector<8x1xf32>
      %c0_17 = arith.constant 0 : index
      %c0_18 = arith.constant 0 : index
      %28 = vector.load %arg4[%c0_17, %c0_18] : memref<8x1xf32, #tpu.memory_space<vmem>>, vector<8x1xf32>
      tpu.vector_store %arg4[%c0_17, %c0_18], %27 {strides = array<i32>} : memref<8x1xf32, #tpu.memory_space<vmem>>, vector<8x1xf32>,
      %cst_19 = arith.constant 0.000000e+00 : f32
      %29 = vector.broadcast %cst_19 : f32 to vector<8x1xf32>
      %c0_20 = arith.constant 0 : index
      %c0_21 = arith.constant 0 : index
      %30 = vector.load %arg5[%c0_20, %c0_21] : memref<8x1xf32, #tpu.memory_space<vmem>>, vector<8x1xf32>
      tpu.vector_store %arg5[%c0_20, %c0_21], %29 {strides = array<i32>} : memref<8x1xf32, #tpu.memory_space<vmem>>, vector<8x1xf32>,
    } else {
    }
    %c0 = arith.constant 0 : index
    %c0_1 = arith.constant 0 : index
    %3 = vector.load %arg2[%c0, %c0_1] : memref<8x128xf32, #tpu.memory_space<vmem>>, vector<8x128xf32>
    %c0_2 = arith.constant 0 : index
    %c0_3 = arith.constant 0 : index
    %4 = vector.load %arg3[%c0_2, %c0_3] : memref<8x128xf32, #tpu.memory_space<vmem>>, vector<8x128xf32>
    tpu.vector_store %arg3[%c0_2, %c0_3], %3 {strides = array<i32>} : memref<8x128xf32, #tpu.memory_space<vmem>>, vector<8x128xf32>,
    %5 = tpu.iota {dimensions = array<i32: 1>} : vector<8x128xi32>
    %c128_i32 = arith.constant 128 : i32
    %6 = arith.muli %arg1, %c128_i32 : i32
    %7 = vector.broadcast %6 : i32 to vector<8x128xi32>
    %8 = arith.addi %7, %5 : vector<8x128xi32>
    %c32_i32 = arith.constant 32 : i32
    %9 = vector.broadcast %c32_i32 : i32 to vector<8x128xi32>
    %10 = arith.cmpi slt, %8, %9 : vector<8x128xi32>
    %cst = arith.constant 0.000000e+00 : f32
    %11 = vector.broadcast %cst : f32 to vector<8x128xf32>
    %12 = arith.select %10, %3, %11 : vector<8x128xi1>, vector<8x128xf32>
    %c0_4 = arith.constant 0 : index
    %c0_5 = arith.constant 0 : index
    %13 = vector.load %arg4[%c0_4, %c0_5] : memref<8x1xf32, #tpu.memory_space<vmem>>, vector<8x1xf32>
    %cst_6 = arith.constant dense<0.000000e+00> : vector<8xf32>
    %14 = vector.multi_reduction <add>, %12, %cst_6 [1] : vector<8x128xf32> to vector<8xf32>
    %15 = vector.shape_cast %14 : vector<8xf32> to vector<8x1xf32>
    %16 = arith.addf %13, %15 : vector<8x1xf32>
    %c0_7 = arith.constant 0 : index
    %c0_8 = arith.constant 0 : index
    %17 = vector.load %arg4[%c0_7, %c0_8] : memref<8x1xf32, #tpu.memory_space<vmem>>, vector<8x1xf32>
    tpu.vector_store %arg4[%c0_7, %c0_8], %16 {strides = array<i32>} : memref<8x1xf32, #tpu.memory_space<vmem>>, vector<8x1xf32>,
    %c0_9 = arith.constant 0 : index
    %c0_10 = arith.constant 0 : index
    %18 = vector.load %arg5[%c0_9, %c0_10] : memref<8x1xf32, #tpu.memory_space<vmem>>, vector<8x1xf32>
    %19 = arith.mulf %12, %12 : vector<8x128xf32>
    %cst_11 = arith.constant dense<0.000000e+00> : vector<8xf32>
    %20 = vector.multi_reduction <add>, %19, %cst_11 [1] : vector<8x128xf32> to vector<8xf32>
    %21 = vector.shape_cast %20 : vector<8xf32> to vector<8x1xf32>
    %22 = arith.addf %18, %21 : vector<8x1xf32>
    %c0_12 = arith.constant 0 : index
    %c0_13 = arith.constant 0 : index
    %23 = vector.load %arg5[%c0_12, %c0_13] : memref<8x1xf32, #tpu.memory_space<vmem>>, vector<8x1xf32>
    tpu.vector_store %arg5[%c0_12, %c0_13], %22 {strides = array<i32>} : memref<8x1xf32, #tpu.memory_space<vmem>>, vector<8x1xf32>,
    %c0_i32_14 = arith.constant 0 : i32
    %24 = arith.cmpi eq, %arg1, %c0_i32_14 : i32
    %25 = arith.extui %24 : i1 to i32
    %c0_i32_15 = arith.constant 0 : i32
    %26 = arith.cmpi ne, %25, %c0_i32_15 : i32
    scf.if %26 {
      %c0_16 = arith.constant 0 : index
      %c0_17 = arith.constant 0 : index
      %27 = vector.load %arg4[%c0_16, %c0_17] : memref<8x1xf32, #tpu.memory_space<vmem>>, vector<8x1xf32>
      %cst_18 = arith.constant 3.125000e-02 : f32
      %28 = vector.broadcast %cst_18 : f32 to vector<8x1xf32>
      %29 = arith.mulf %27, %28 : vector<8x1xf32>
      %c0_19 = arith.constant 0 : index
      %c0_20 = arith.constant 0 : index
      %30 = vector.load %arg5[%c0_19, %c0_20] : memref<8x1xf32, #tpu.memory_space<vmem>>, vector<8x1xf32>
      %31 = arith.mulf %27, %29 : vector<8x1xf32>
      %32 = arith.subf %30, %31 : vector<8x1xf32>
      %cst_21 = arith.constant 0.0322580636 : f32
      %33 = vector.broadcast %cst_21 : f32 to vector<8x1xf32>
      %34 = arith.mulf %32, %33 : vector<8x1xf32>
      %35 = tpu.iota {dimensions = array<i32: 1>} : vector<8x2xi32>
      %c0_i32_22 = arith.constant 0 : i32
      %36 = vector.broadcast %c0_i32_22 : i32 to vector<8x2xi32>
      %37 = arith.cmpi eq, %35, %36 : vector<8x2xi32>
      %38 = vector.shape_cast %34 : vector<8x1xf32> to vector<8x1xf32>
      %39 = vector.broadcast %38 : vector<8x1xf32> to vector<8x2xf32>
      %40 = vector.shape_cast %29 : vector<8x1xf32> to vector<8x1xf32>
      %41 = vector.broadcast %40 : vector<8x1xf32> to vector<8x2xf32>
      %42 = arith.select %37, %39, %41 : vector<8x2xi1>, vector<8x2xf32>
      %c0_23 = arith.constant 0 : index
      %c32 = arith.constant 32 : index
      %43 = vector.load %arg3[%c0_23, %c32] : memref<8x128xf32, #tpu.memory_space<vmem>>, vector<8x2xf32>
      tpu.vector_store %arg3[%c0_23, %c32], %42 {strides = array<i32>} : memref<8x128xf32, #tpu.memory_space<vmem>>, vector<8x2xf32>,
    } else {
    }
    return
  }
  func.func @transform_0(%arg0: i32, %arg1: i32) -> (i32, i32) {
    %c0_i32 = arith.constant 0 : i32
    %0 = arith.minsi %arg1, %c0_i32 : i32
    %c0_i32_0 = arith.constant 0 : i32
    return %arg0, %0 : i32, i32
  }
  func.func @transform_1(%arg0: i32, %arg1: i32) -> (i32, i32) {
    %c0_i32 = arith.constant 0 : i32
    return %arg0, %arg1 : i32, i32
  }
}

</mosaic_0001>

<bundles_post_ra>
// kernel: tpu_custom_call.1
= control target key start
LH: loop header
LB: loop body
LE: loop exit
PB: predicated region body
PF: predicated region fallthrough
CT: control target
= control target key end

     0   :  { %6 = vsyncpa [#allocation5], 0  ;;  %s189_s0 = inlined_call_operand.hbm [shape: f32[8,32], index: 0, kind: input, shape index: {}]   ;;  %s190_s1 = inlined_call_operand.hbm [shape: f32[8,34], index: 1, kind: output, shape index: {}]  }
   0x1   :  { %7 = vsyncpa [#allocation6], 0  ;;  %s146_s6 = smov [#allocation4]   ;;  %s98_s10 = scalar_lea.hbm %s189_s0, 128 }
   0x2   :  { %s14_s7 = sshll.u32 %s146_s6, 4  ;;  %p99_p0 = scmp.ne.s32.totalorder %s189_s0, %s98_s10  ;;  %s15_s7 = int_to_ptr.vmem [resolvable:$true] %s14_s7 }
   0x3   :  { %p102_p1 = scmp.lt.u32.totalorder %s98_s10, %s189_s0 }
   0x5   :  { %p104_p2 = pnand %p102_p1, %p99_p0 }
   0x7   :  { %107 = shalt.err (!%p104_p2)
}
   0x8   :  { %s108_s15 = scalar_lea.vmem %s15_s7, 128  ;;  %p113_p4 = scmp.lt.s32.totalorder %s15_s7, %s15_s7 }
   0x9   :  { %p109_p3 = scmp.ne.s32.totalorder %s15_s7, %s108_s15  ;;  %p114_p5 = scmp.lt.s32.totalorder %s108_s15, %s108_s15 }
   0xb   :  { %p115_p6 = por %p114_p5, %p113_p4 }
   0xd   :  { %p116_p7 = pnand %p115_p6, %p109_p3 }
   0xf   :  { %119 = shalt.err (!%p116_p7)
}
  0x10   :  { %17 = dma.hbm_to_vmem [thread:$0]  %s189_s0, 128, %s15_s7, [#allocation5]  }
  0x11   :  { %142 = dma.done.wait [#allocation5], 128  }
  0x12   :  { %143 = vsyncadd [#allocation5], 4294967168  ;;  %v30_v0 = vlaneseq  ;;  %vm25_vm0 = vcmask 7168   ;;  %v147_v1 = vmov 0.0   ;;  %v28_v3 = vld [vmem:[#allocation4] sm:$0xff]  ;;  %v148_v6 = vmov 0  }
  0x13   :  { %26 = vst.msk [vmem:[#allocation2] sm:$0xff] %vm25_vm0, %v147_v1  ;;  %27 = vst.msk [vmem:[#allocation3] sm:$0xff] %vm25_vm0, %v147_v1  ;;  %96 = vset.pattern.permute.xlu1 %v148_v6  ;;  %97 = vset.pattern.permute.xlu0 %v148_v6  ;;  %s149_s0 = smov 32   ;;  %s150_s18 = smov [#allocation7]   ;;  %vm74_vm3 = vcmask 277760  }
  0x14   :  { %v31_v2 = vand.u32 127, %v30_v0  ;;  %29 = vst [vmem:[#allocation7] sm:$0xff] %v28_v3  ;;  %s82_s19 = sshll.u32 %s150_s18, 4  ;;  %s83_s19 = int_to_ptr.vmem [resolvable:$true] %s82_s19 }
  0x15   :  { %s120_s20 = scalar_lea.vmem %s83_s19, 128  ;;  %p125_p9 = scmp.lt.s32.totalorder %s83_s19, %s83_s19 }
  0x16   :  { %vm35_vm1 = vcmp.lt.s32.totalorder %v31_v2, 32  ;;  %vm58_vm2 = vcmp.eq.s32.totalorder %v31_v2, 0  ;;  %p121_p8 = scmp.ne.s32.totalorder %s83_s19, %s120_s20  ;;  %p126_p10 = scmp.lt.s32.totalorder %s120_s20, %s120_s20 }
  0x17   :  { %v36_v4 = vsel %vm35_vm1, %v28_v3, 0.0 }
  0x18   :  { %38 = vadd.xlane.f32.xlu0 %v36_v4  ;;  %v44_v5 = vmul.f32 %v36_v4, %v36_v4  ;;  %p127_p11 = por %p126_p10, %p125_p9 }
  0x1a   :  { %v37_v7 = vld [vmem:[#allocation2] sm:$0xff]  ;;  %v43_v10 = vld [vmem:[#allocation3] sm:$0xff]  ;;  %p128_p12 = pnand %p127_p11, %p121_p8 }
  0x1c   :  { %45 = vadd.xlane.f32.xlu0 %v44_v5 }
  0xa5   :  { %v39_v8 = vpop.xlane.xlu0 %38 }
  0xa6   :  { %v40_v9 = vadd.f32 %v39_v8, %v37_v7 }
  0xa8   :  { %42 = vst.msk [vmem:[#allocation2] sm:$0xff] %vm25_vm0, %v40_v9 }
  0xa9   :  { %v46_v11 = vpop.xlane.xlu0 %45 }
  0xaa   :  { %v47_v12 = vadd.f32 %v46_v11, %v43_v10 }
  0xac   :  { %48 = vst.msk [vmem:[#allocation3] sm:$0xff] %vm25_vm0, %v47_v12 }
  0xaf   :  { %v52_v13 = vld [vmem:[#allocation2] sm:$0xff] }
  0xb0   :  { %v53_v14 = vmul.f32 0.03125, %v52_v13 }
  0xb2   :  { %v55_v15 = vmul.f32 %v53_v14, %v52_v13 }
  0xb3   :  { %v54_v16 = vld [vmem:[#allocation3] sm:$0xff] }
  0xb4   :  { %v56_v17 = vsub.f32 %v54_v16, %v55_v15 }
  0xb6   :  { %v57_v18 = vmul.f32 0.032258064, %v56_v17 }
  0xb8   :  { %61 = vperm.xlu1 %96, %v57_v18  }
  0xbc   :  { %66 = vperm.xlu1 %96, %v53_v14  }
 0x137   :  { %v62_v19 = vpop.permute.xlu1 %61 }
 0x13b   :  { %v67_v20 = vpop.permute.xlu1 %66 }
 0x13c   :  { %v69_v21 = vsel %vm58_vm2, %v62_v19, %v67_v20 }
 0x13d   :  { %71 = vrot.lane.b32.xlu0 %v69_v21, %s149_s0 }
 0x1af   :  { %v72_v22 = vpop.permute.xlu0 %71 }
 0x1b0   :  { %75 = vst.msk [vmem:[#allocation7] sm:$0xff] %vm74_vm3, %v72_v22 }
 0x1b1   :  { %131 = shalt.err (!%p128_p12)
}
 0x1b2   :  { %s132_s23 = scalar_lea.hbm %s190_s1, 128 }
 0x1b3   :  { %p133_p13 = scmp.ne.s32.totalorder %s190_s1, %s132_s23  ;;  %p136_p0 = scmp.lt.u32.totalorder %s132_s23, %s190_s1 }
 0x1b5   :  { %p138_p1 = pnand %p136_p0, %p133_p13 }
 0x1b7   :  { %141 = shalt.err (!%p138_p1)
}
 0x1b8   :  { %85 = dma.vmem_to_hbm [thread:$0]  %s83_s19, 128, %s190_s1, [#allocation6]  }
 0x1b9   :  { %144 = dma.done.wait [#allocation6], 128  }
 0x1ba   :  { %145 = vsyncadd [#allocation6], 4294967168 }
 0x1bb   :  { %89 = vsyncpa [#allocation5], 1 }
 0x1bc   :  { %90 = vsyncpa [#allocation6], 1 }

</bundles_post_ra>
